<compile_context>
chip_gen: v7x
topology: tpu7x:2x2x1
jax: 0.10.0
libtpu: 0.0.40
codegen_flags: <defaults>
</compile_context>

<pallas_src>
import functools
import math

import jax
import jax.numpy as jnp
from jax.experimental import pallas as pl
from jax.experimental.pallas import tpu as pltpu


def _sheaf_kernel(w_ref, xcat_ref, o_ref):
    # One MXU matmul (K = 2C) feeding EUP tanh; the store is lane-dense.
    acc = jnp.dot(w_ref[...], xcat_ref[...], preferred_element_type=jnp.float32)
    o_ref[...] = jnp.tanh(acc).astype(o_ref.dtype)


def _pick_tile_e(E, C, F_out):
    """Largest lane-aligned edge tile that fits a conservative VMEM budget."""
    # Double-buffered input stream + double-buffered output, 4 bytes/elem.
    per_edge_bytes = 4 * (2 * (2 * C) + 2 * F_out)
    budget = 8 << 20                                   # ~8 MiB for streamed buffers
    tile_e = (budget // per_edge_bytes) // 128 * 128
    tile_e = max(128, min(2048, tile_e))
    e_blocks = pl.cdiv(E, 128)
    # Never pad the edge axis beyond what E needs...
    tile_e = min(tile_e, e_blocks * 128)
    # ...and keep >= 2 grid steps when possible (v7x has 2 TensorCores).
    if e_blocks >= 2:
        tile_e = min(tile_e, ((e_blocks + 1) // 2) * 128)
    return max(128, tile_e)


@functools.partial(jax.jit, static_argnames=("out_shape", "tile_e"))
def local_concat_sheaf_learner(x, edge_index, weight, out_shape, tile_e=None):
    N, C = x.shape
    F_out = int(math.prod(out_shape))
    E = edge_index.shape[1]
    if E == 0:  # zero-size grid would be invalid; short-circuit
        return jnp.zeros((0,) + tuple(out_shape), jnp.float32)

    if tile_e is None:
        tile_e = _pick_tile_e(E, C, F_out)

    row, col = edge_index[0], edge_index[1]

    # Single fused producer: gather -> concat -> lane-major (2C, E) -> pad -> f32.
    xT = x.astype(jnp.float32).T                                   # (C, N)
    x_cat = jnp.concatenate([jnp.take(xT, row, axis=1),
                             jnp.take(xT, col, axis=1)], axis=0)   # (2C, E)

    e_pad = pl.cdiv(E, tile_e) * tile_e
    if e_pad != E:
        x_cat = jnp.pad(x_cat, ((0, 0), (0, e_pad - E)))           # zero cols -> tanh(0)=0

    w = weight.astype(jnp.float32)                                 # (F_out, 2C)

    # Explicit VMEM limit: 2x margin over the double-buffered working set,
    # capped well below every generation's physical VMEM.
    working_set = 4 * (2 * (2 * C) * tile_e      # x_cat tiles (double-buffered)
                       + 2 * F_out * tile_e      # output tiles (double-buffered)
                       + 2 * F_out * (2 * C))    # resident weight
    vmem_limit = int(min(32 << 20, max(4 << 20, 2 * working_set)))

    maps_t = pl.pallas_call(
        _sheaf_kernel,
        out_shape=jax.ShapeDtypeStruct((F_out, e_pad), jnp.float32),
        grid_spec=pltpu.PrefetchScalarGridSpec(
            num_scalar_prefetch=0,
            grid=(e_pad // tile_e,),
            in_specs=[
                pl.BlockSpec((F_out, 2 * C), lambda i: (0, 0)),    # W (resident)
                pl.BlockSpec((2 * C, tile_e), lambda i: (0, i)),   # X_cat^T tile
            ],
            out_specs=pl.BlockSpec((F_out, tile_e), lambda i: (0, i)),
        ),
        compiler_params=pltpu.CompilerParams(
            dimension_semantics=("parallel",),
            vmem_limit_bytes=vmem_limit),
    )(w, x_cat)

    maps = maps_t[:, :E].T                                         # (E, F_out)
    if len(out_shape) == 2:
        return maps.reshape(-1, out_shape[0], out_shape[1])
    return maps.reshape(-1, out_shape[0])


if __name__ == "__main__":
    key = jax.random.PRNGKey(0)
    k_x, k_e1, k_e2, k_w = jax.random.split(key, 4)

    # Small shapes consistent with the module: N nodes with C features,
    # E edges, out_shape = (d, d) restriction maps.
    N, C, E = 8, 16, 16
    out_shape = (3, 3)
    F_out = int(math.prod(out_shape))

    x = jax.random.normal(k_x, (N, C), dtype=jnp.float32)
    row = jax.random.randint(k_e1, (E,), 0, N, dtype=jnp.int32)
    col = jax.random.randint(k_e2, (E,), 0, N, dtype=jnp.int32)
    edge_index = jnp.stack([row, col], axis=0)                     # (2, E)

    # Deterministic weight init (nn.Linear(in=2C, out=F_out, bias=False)):
    # weight shape (F_out, 2C), uniform(-1/sqrt(2C), 1/sqrt(2C)) like PyTorch.
    bound = 1.0 / math.sqrt(2 * C)
    weight = jax.random.uniform(k_w, (F_out, 2 * C), dtype=jnp.float32,
                                minval=-bound, maxval=bound)

    out = local_concat_sheaf_learner(x, edge_index, weight, out_shape)
    out = jax.block_until_ready(out)

    # Pure-JAX reference check of the forward semantics.
    ref = jnp.tanh(
        jnp.concatenate([x[row], x[col]], axis=1) @ weight.T
    ).reshape(-1, out_shape[0], out_shape[1])
    assert out.shape == (E, out_shape[0], out_shape[1]), out.shape
    assert jnp.allclose(out, ref, atol=1e-5, rtol=1e-5), \
        float(jnp.max(jnp.abs(out - ref)))

    print("KERNEL_OK")
</pallas_src>

<mosaic_0001>
module attributes {stable_mosaic.version = 11 : i64} {
  func.func @_sheaf_kernel(%arg0: i32, %arg1: memref<9x32xf32, #tpu.memory_space<vmem>>, %arg2: memref<32x128xf32, #tpu.memory_space<vmem>>, %arg3: memref<9x128xf32, #tpu.memory_space<vmem>>) attributes {dimension_semantics = [#tpu.dimension_semantics<parallel>], iteration_bounds = array<i64: 1>, scalar_prefetch = 0 : i64, scratch_operands = 0 : i64, tpu.core_type = #tpu.core_type<tc>, window_params = [{pipeline_mode = #tpu.pipeline_mode<synchronous>, transform_indices = @transform_0, window_bounds = array<i64: 9, 32>}, {transform_indices = @transform_1, window_bounds = array<i64: 32, 128>}, {transform_indices = @transform_2, window_bounds = array<i64: 9, 128>}]} {
    %c0 = arith.constant 0 : index
    %c0_0 = arith.constant 0 : index
    %0 = vector.load %arg1[%c0, %c0_0] : memref<9x32xf32, #tpu.memory_space<vmem>>, vector<9x32xf32>
    %c0_1 = arith.constant 0 : index
    %c0_2 = arith.constant 0 : index
    %1 = vector.load %arg2[%c0_1, %c0_2] : memref<32x128xf32, #tpu.memory_space<vmem>>, vector<32x128xf32>
    %cst = arith.constant dense<0.000000e+00> : vector<9x128xf32>
    %2 = tpu.matmul %0, %1, %cst {dimension_numbers = #tpu.dot_dimension_numbers<[1], [0], [0], [1], [0, 0, 1, 1], [], []>} : vector<9x32xf32>, vector<32x128xf32>, vector<9x128xf32> -> vector<9x128xf32>
    %3 = math.tanh %2 : vector<9x128xf32>
    %c0_3 = arith.constant 0 : index
    %c0_4 = arith.constant 0 : index
    %4 = vector.load %arg3[%c0_3, %c0_4] : memref<9x128xf32, #tpu.memory_space<vmem>>, vector<9x128xf32>
    tpu.vector_store %arg3[%c0_3, %c0_4], %3 {strides = array<i32>} : memref<9x128xf32, #tpu.memory_space<vmem>>, vector<9x128xf32>,
    return
  }
  func.func @transform_0(%arg0: i32) -> (i32, i32) {
    %c0_i32 = arith.constant 0 : i32
    %c0_i32_0 = arith.constant 0 : i32
    %c0_i32_1 = arith.constant 0 : i32
    return %c0_i32, %c0_i32_0 : i32, i32
  }
  func.func @transform_1(%arg0: i32) -> (i32, i32) {
    %c0_i32 = arith.constant 0 : i32
    %c0_i32_0 = arith.constant 0 : i32
    return %c0_i32, %arg0 : i32, i32
  }
  func.func @transform_2(%arg0: i32) -> (i32, i32) {
    %c0_i32 = arith.constant 0 : i32
    %c0_i32_0 = arith.constant 0 : i32
    return %c0_i32, %arg0 : i32, i32
  }
}

</mosaic_0001>

<bundles_post_ra>
// kernel: local_concat_sheaf_learner.1
= control target key start
LH: loop header
LB: loop body
LE: loop exit
PB: predicated region body
PF: predicated region fallthrough
CT: control target
= control target key end

     0   :  { %vm17_vm0 = vcmask 261120   ;;  %s177_s1 = inlined_call_operand.vmem [shape: f32[32,128], index: 1, kind: input, shape index: {}]   ;;  %s178_s0 = inlined_call_operand.vmem [shape: f32[9,32], index: 0, kind: input, shape index: {}]   ;;  %s179_s2 = inlined_call_operand.vmem [shape: f32[9,128], index: 2, kind: output, shape index: {}]  }
   0x1   :  { %v13_v0 = vld [vmem:[%s177_s1] sm:$0xff]  ;;  %v14_v1 = vld [vmem:[%s177_s1 + $0x8] sm:$0xff]  ;;  %v15_v2 = vld [vmem:[%s177_s1 + $0x10] sm:$0xff] }
   0x2   :  { %v126_v3 = vpack.c.bf16 %v14_v1, %v13_v0  ;;  %v16_v4 = vld [vmem:[%s177_s1 + $0x18] sm:$0xff]  ;;  %v11_v5 = vld [vmem:[%s178_s0] sm:$0xff]  ;;  %v12_v7 = vld [vmem:[%s178_s0 + $0x8] sm:$0x1] }
   0x3   :  { %v130_v6 = vpack.c.bf16 %v16_v4, %v15_v2  ;;  %123 = vmatprep.mubr.msk.f32.mxu0 %vm17_vm0, %v11_v5 }
   0x4   :  { %127 = vmatprep.subr.bf16.mxu0 %v126_v3 }
   0x5   :  { %129 = vmatpush3.bf16.msra.mxu0 %v126_v3 }
   0x6   :  { %131 = vmatprep.subr.bf16.mxu0 %v130_v6 }
   0x9   :  { %133 = vmatpush3.bf16.msra.mxu0 %v130_v6 }
   0xc   :  { %124 = vmatmul.mubr.msk.f32.vlgmr.msra.gmra.mrb[0].mxu0 %vm17_vm0, %v12_v7 }
  0xdf   :  { %v125_v8 = vpop.f32.mrb[0].mxu0 }
  0xe0   :  { %134 = vtanh.f32 %v125_v8  ;;  %v90_v9 = vpop.f32.mrb[1].mxu0 }
  0xe1   :  { %136 = vtanh.f32 %v90_v9 }
  0xea   :  { %v135_v10 = vpop.eup %134 }
  0xeb   :  { %v137_v11 = vpop.eup %136  ;;  %102 = vst [vmem:[%s179_s2 + $0x8] sm:$0x1] %v135_v10 }
  0xec   :  { %101 = vst [vmem:[%s179_s2] sm:$0xff] %v137_v11 }

</bundles_post_ra>
